<compile_context>
chip_gen: v7x
topology: tpu7x:2x2x1
jax: 0.10.0
libtpu: 0.0.40
codegen_flags: <defaults>
</compile_context>

<pallas_src>
import functools

import jax
import jax.numpy as jnp
from jax.experimental import pallas as pl
from jax.experimental.pallas import tpu as pltpu


def refined_fused_kernel(x_ref, we_ref, be_ref, wh_ref, bh_ref, out_ref):
    """One batch tile: encoder Linear+ReLU, then the fused (dst|kp) head matmul."""
    # encoder: x @ We  (MXU, f32 accumulation) + bias + ReLU
    h = jnp.dot(x_ref[...], we_ref[...], preferred_element_type=jnp.float32)
    h = jnp.maximum(h + be_ref[...], 0.0)
    # fused heads: h @ [Wd | Wk]  -> single lane-denser output slab
    y = jnp.dot(h.astype(wh_ref.dtype), wh_ref[...],
                preferred_element_type=jnp.float32)
    out_ref[...] = (y + bh_ref[...]).astype(out_ref.dtype)


def _vmem_limit_bytes(tb, x_itemsize, out_itemsize):
    """Scoped-VMEM estimate for one grid step (lane-padded, double-buffered)."""
    # x & out blocks pad their last dim to 128 lanes and are double-buffered by
    # the BlockSpec pipeline; the f32 intermediate h lives once; the fused
    # weights / biases are < 0.5 MiB total.
    per_row = 128 * (2 * x_itemsize + 2 * out_itemsize + 4)
    est = tb * per_row + (2 << 20)          # + slack for weights / misc
    if est <= (32 << 20):                   # fits the default scoped-VMEM limit
        return None
    # Cap at 64 MiB so the request stays legal on v7x (64 MiB physical VMEM/TC).
    # On v5e/v6e (128 MiB physical) this cap can be raised when sweeping tiles.
    return min(int(est * 1.25), 64 << 20)


@functools.partial(jax.jit, static_argnames=("d_dst", "tile_b", "core_parallel"))
def _refined_forward_impl(x, we, be, wh, bh, *, d_dst, tile_b, core_parallel):
    B, d_in = x.shape
    hid = we.shape[1]
    d_heads = wh.shape[1]
    out_dtype = x.dtype   # bf16 in -> bf16 out (deployment); f32 in -> f32 out

    # Batch tiling without ever copying / padding x in HBM:
    #  * B <= tile_b : one block covering the whole batch (block == full array
    #    dim, so the (8,128)/(16,128) divisibility rule does not apply).
    #  * B  > tile_b : 16-row-aligned tile (bf16 sublane-packing safe); the
    #    ragged last block is handled by Pallas (OOB input rows are undefined
    #    but row-independent; OOB output rows are masked on writeback).
    if B <= tile_b:
        tb = B
    else:
        tb = max(16, (min(tile_b, B) // 16) * 16)
    grid = pl.cdiv(B, tb)

    sem = pltpu.CORE_PARALLEL if core_parallel else "parallel"
    cp_kwargs = dict(dimension_semantics=(sem,))
    vl = _vmem_limit_bytes(tb, x.dtype.itemsize, jnp.dtype(out_dtype).itemsize)
    if vl is not None:
        cp_kwargs["vmem_limit_bytes"] = vl

    out = pl.pallas_call(
        refined_fused_kernel,
        out_shape=jax.ShapeDtypeStruct((B, d_heads), out_dtype),
        grid=(grid,),
        in_specs=[
            pl.BlockSpec((tb, d_in), lambda i: (i, 0)),       # x: streamed per tile
            pl.BlockSpec((d_in, hid), lambda i: (0, 0)),      # We: VMEM-resident
            pl.BlockSpec((1, hid), lambda i: (0, 0)),         # be: VMEM-resident
            pl.BlockSpec((hid, d_heads), lambda i: (0, 0)),   # [Wd|Wk]: VMEM-resident
            pl.BlockSpec((1, d_heads), lambda i: (0, 0)),     # [bd|bk]: VMEM-resident
        ],
        out_specs=pl.BlockSpec((tb, d_heads), lambda i: (i, 0)),
        compiler_params=pltpu.CompilerParams(**cp_kwargs),
    )(x, we, be, wh, bh)

    # Head split is a pair of free column slices on the fused output slab.
    return out[:, :d_dst], out[:, d_dst:]


# CORE_PARALLEL is the only dimension-semantics value that actually shards grid
# steps across v7x's two TensorCores; attempt it first and permanently fall back
# to "parallel" on the first lowering failure (older jax / unsupported target).
_CP_STATE = {
    "use": getattr(pltpu, "CORE_PARALLEL", None) is not None,
    "validated": set(),
}


def refined_forward(x, fused, *, tile_b=8192):
    """Fused encoder + two-head forward.  `fused` comes from prepare_params()."""
    args = (x, fused["we"], fused["be"], fused["wh"], fused["bh"])
    kwargs = dict(d_dst=fused["d_dst"], tile_b=tile_b)
    if _CP_STATE["use"]:
        sig = (x.shape, str(x.dtype), tile_b)
        try:
            out = _refined_forward_impl(*args, core_parallel=True, **kwargs)
            if sig not in _CP_STATE["validated"]:
                jax.block_until_ready(out)      # one-time per-shape validation
                _CP_STATE["validated"].add(sig)
            return out
        except Exception:
            _CP_STATE["use"] = False            # chip/jax rejects CORE_PARALLEL
    return _refined_forward_impl(*args, core_parallel=False, **kwargs)


def prepare_params(params, *, param_dtype=None):
    """Fuse the two head weights/biases and (optionally) cast -- ONCE per param set.

    Hoisted out of the per-call path so the concat / dtype casts are not
    re-emitted in HBM on every forward call.  Biases stay f32 (bias adds are
    done in f32 inside the kernel).
    """
    we = params["we"]
    wh = jnp.concatenate([params["wd"], params["wk"]], axis=1)   # (HID, D_DST+D_KP)
    bh = jnp.concatenate([params["bd"], params["bk"]], axis=1)   # (1,   D_DST+D_KP)
    if param_dtype is not None:
        we = we.astype(param_dtype)
        wh = wh.astype(param_dtype)
    return {
        "we": we,
        "be": params["be"].astype(jnp.float32),
        "wh": wh,
        "bh": bh.astype(jnp.float32),
        "d_dst": int(params["wd"].shape[1]),
    }


def init_params(key, d_in, hid, d_dst, d_kp):
    """Deterministic parameter init (PyTorch-Linear-style uniform bounds)."""
    ks = jax.random.split(key, 6)

    def lin(kw, kb, fan_in, fan_out):
        bound = 1.0 / jnp.sqrt(fan_in)
        w = jax.random.uniform(kw, (fan_in, fan_out), jnp.float32, -bound, bound)
        b = jax.random.uniform(kb, (1, fan_out), jnp.float32, -bound, bound)
        return w, b

    we, be = lin(ks[0], ks[1], d_in, hid)
    wd, bd = lin(ks[2], ks[3], hid, d_dst)
    wk, bk = lin(ks[4], ks[5], hid, d_kp)
    return {"we": we, "be": be, "wd": wd, "bd": bd, "wk": wk, "bk": bk}


def refined_forward_ref(x, p):
    """Pure-JAX reference for correctness checking."""
    h = jnp.maximum(x @ p["we"] + p["be"], 0.0)
    return h @ p["wd"] + p["bd"], h @ p["wk"] + p["bk"]


if __name__ == "__main__":
    D_IN, HID, D_DST, D_KP = 32, 64, 16, 8

    key = jax.random.PRNGKey(0)
    k_x, k_p, k_x2 = jax.random.split(key, 3)
    params = init_params(k_p, D_IN, HID, D_DST, D_KP)

    # Fuse / pre-cast weights ONCE (hoisted out of the per-call path).
    fused_f32 = prepare_params(params)

    # --- check 1: small batch, f32 end-to-end, strict tolerance --------------
    B = 2
    x = jax.random.normal(k_x, (B, D_IN), jnp.float32)
    dst_out, kp_out = refined_forward(x, fused_f32)
    jax.block_until_ready((dst_out, kp_out))
    dst_ref, kp_ref = refined_forward_ref(x, params)
    assert dst_out.shape == (B, D_DST) and kp_out.shape == (B, D_KP)
    assert jnp.allclose(dst_out, dst_ref, atol=1e-5, rtol=1e-5)
    assert jnp.allclose(kp_out, kp_ref, atol=1e-5, rtol=1e-5)

    # --- check 2: batch grid with a ragged last block (no HBM padding copy) --
    B2 = 40
    x2 = jax.random.normal(k_x2, (B2, D_IN), jnp.float32)
    dst2, kp2 = refined_forward(x2, fused_f32, tile_b=16)   # 3 tiles, last partial
    jax.block_until_ready((dst2, kp2))
    dst2_ref, kp2_ref = refined_forward_ref(x2, params)
    assert dst2.shape == (B2, D_DST) and kp2.shape == (B2, D_KP)
    assert jnp.allclose(dst2, dst2_ref, atol=1e-5, rtol=1e-5)
    assert jnp.allclose(kp2, kp2_ref, atol=1e-5, rtol=1e-5)

    # --- check 3: bf16 deployment path (x already bf16 upstream, bf16 weights,
    #     bf16 output; f32 MXU accumulation + f32 bias adds inside the kernel) -
    fused_bf16 = prepare_params(params, param_dtype=jnp.bfloat16)
    x2_bf16 = x2.astype(jnp.bfloat16)   # stands in for an upstream bf16 producer
    dst3, kp3 = refined_forward(x2_bf16, fused_bf16, tile_b=16)
    jax.block_until_ready((dst3, kp3))
    assert dst3.dtype == jnp.bfloat16 and kp3.dtype == jnp.bfloat16
    assert jnp.allclose(dst3.astype(jnp.float32), dst2_ref, atol=1e-1, rtol=5e-2)
    assert jnp.allclose(kp3.astype(jnp.float32), kp2_ref, atol=1e-1, rtol=5e-2)

    print("KERNEL_OK")
</pallas_src>

<mosaic_0001>
module attributes {stable_mosaic.version = 11 : i64} {
  func.func @refined_fused_kernel(%arg0: i32, %arg1: memref<2x32xf32, #tpu.memory_space<vmem>>, %arg2: memref<32x64xf32, #tpu.memory_space<vmem>>, %arg3: memref<1x64xf32, #tpu.memory_space<vmem>>, %arg4: memref<64x24xf32, #tpu.memory_space<vmem>>, %arg5: memref<1x24xf32, #tpu.memory_space<vmem>>, %arg6: memref<2x24xf32, #tpu.memory_space<vmem>>) attributes {dimension_semantics = [#tpu.dimension_semantics<core_parallel>], iteration_bounds = array<i64: 1>, scalar_prefetch = 0 : i64, scratch_operands = 0 : i64, tpu.core_type = #tpu.core_type<tc>, window_params = [{transform_indices = @transform_0, window_bounds = array<i64: 2, 32>}, {pipeline_mode = #tpu.pipeline_mode<synchronous>, transform_indices = @transform_1, window_bounds = array<i64: 32, 64>}, {pipeline_mode = #tpu.pipeline_mode<synchronous>, transform_indices = @transform_2, window_bounds = array<i64: 1, 64>}, {pipeline_mode = #tpu.pipeline_mode<synchronous>, transform_indices = @transform_3, window_bounds = array<i64: 64, 24>}, {pipeline_mode = #tpu.pipeline_mode<synchronous>, transform_indices = @transform_4, window_bounds = array<i64: 1, 24>}, {transform_indices = @transform_5, window_bounds = array<i64: 2, 24>}]} {
    %c0 = arith.constant 0 : index
    %c0_0 = arith.constant 0 : index
    %0 = vector.load %arg1[%c0, %c0_0] : memref<2x32xf32, #tpu.memory_space<vmem>>, vector<2x32xf32>
    %c0_1 = arith.constant 0 : index
    %c0_2 = arith.constant 0 : index
    %1 = vector.load %arg2[%c0_1, %c0_2] : memref<32x64xf32, #tpu.memory_space<vmem>>, vector<32x64xf32>
    %cst = arith.constant dense<0.000000e+00> : vector<2x64xf32>
    %2 = tpu.matmul %0, %1, %cst {dimension_numbers = #tpu.dot_dimension_numbers<[1], [0], [0], [1], [0, 0, 1, 1], [], []>} : vector<2x32xf32>, vector<32x64xf32>, vector<2x64xf32> -> vector<2x64xf32>
    %c0_3 = arith.constant 0 : index
    %c0_4 = arith.constant 0 : index
    %3 = vector.load %arg3[%c0_3, %c0_4] : memref<1x64xf32, #tpu.memory_space<vmem>>, vector<1x64xf32>
    %4 = vector.broadcast %3 : vector<1x64xf32> to vector<2x64xf32>
    %5 = arith.addf %2, %4 : vector<2x64xf32>
    %cst_5 = arith.constant 0.000000e+00 : f32
    %6 = vector.broadcast %cst_5 : f32 to vector<2x64xf32>
    %7 = arith.maximumf %5, %6 : vector<2x64xf32>
    %c0_6 = arith.constant 0 : index
    %c0_7 = arith.constant 0 : index
    %8 = vector.load %arg4[%c0_6, %c0_7] : memref<64x24xf32, #tpu.memory_space<vmem>>, vector<64x24xf32>
    %cst_8 = arith.constant dense<0.000000e+00> : vector<2x24xf32>
    %9 = tpu.matmul %7, %8, %cst_8 {dimension_numbers = #tpu.dot_dimension_numbers<[1], [0], [0], [1], [0, 0, 1, 1], [], []>} : vector<2x64xf32>, vector<64x24xf32>, vector<2x24xf32> -> vector<2x24xf32>
    %c0_9 = arith.constant 0 : index
    %c0_10 = arith.constant 0 : index
    %10 = vector.load %arg5[%c0_9, %c0_10] : memref<1x24xf32, #tpu.memory_space<vmem>>, vector<1x24xf32>
    %11 = vector.broadcast %10 : vector<1x24xf32> to vector<2x24xf32>
    %12 = arith.addf %9, %11 : vector<2x24xf32>
    %c0_11 = arith.constant 0 : index
    %c0_12 = arith.constant 0 : index
    %13 = vector.load %arg6[%c0_11, %c0_12] : memref<2x24xf32, #tpu.memory_space<vmem>>, vector<2x24xf32>
    tpu.vector_store %arg6[%c0_11, %c0_12], %12 {strides = array<i32>} : memref<2x24xf32, #tpu.memory_space<vmem>>, vector<2x24xf32>,
    return
  }
  func.func @transform_0(%arg0: i32) -> (i32, i32) {
    %c0_i32 = arith.constant 0 : i32
    %c0_i32_0 = arith.constant 0 : i32
    return %arg0, %c0_i32 : i32, i32
  }
  func.func @transform_1(%arg0: i32) -> (i32, i32) {
    %c0_i32 = arith.constant 0 : i32
    %c0_i32_0 = arith.constant 0 : i32
    %c0_i32_1 = arith.constant 0 : i32
    return %c0_i32, %c0_i32_0 : i32, i32
  }
  func.func @transform_2(%arg0: i32) -> (i32, i32) {
    %c0_i32 = arith.constant 0 : i32
    %c0_i32_0 = arith.constant 0 : i32
    %c0_i32_1 = arith.constant 0 : i32
    return %c0_i32, %c0_i32_0 : i32, i32
  }
  func.func @transform_3(%arg0: i32) -> (i32, i32) {
    %c0_i32 = arith.constant 0 : i32
    %c0_i32_0 = arith.constant 0 : i32
    %c0_i32_1 = arith.constant 0 : i32
    return %c0_i32, %c0_i32_0 : i32, i32
  }
  func.func @transform_4(%arg0: i32) -> (i32, i32) {
    %c0_i32 = arith.constant 0 : i32
    %c0_i32_0 = arith.constant 0 : i32
    %c0_i32_1 = arith.constant 0 : i32
    return %c0_i32, %c0_i32_0 : i32, i32
  }
  func.func @transform_5(%arg0: i32) -> (i32, i32) {
    %c0_i32 = arith.constant 0 : i32
    %c0_i32_0 = arith.constant 0 : i32
    return %arg0, %c0_i32 : i32, i32
  }
}

module attributes {stable_mosaic.version = 11 : i64} {
  func.func @refined_fused_kernel(%arg0: i32, %arg1: memref<2x32xf32, #tpu.memory_space<vmem>>, %arg2: memref<32x64xf32, #tpu.memory_space<vmem>>, %arg3: memref<1x64xf32, #tpu.memory_space<vmem>>, %arg4: memref<64x24xf32, #tpu.memory_space<vmem>>, %arg5: memref<1x24xf32, #tpu.memory_space<vmem>>, %arg6: memref<2x24xf32, #tpu.memory_space<vmem>>) attributes {dimension_semantics = [#tpu.dimension_semantics<parallel>], iteration_bounds = array<i64: 1>, scalar_prefetch = 0 : i64, scratch_operands = 0 : i64, tpu.core_type = #tpu.core_type<tc>, window_params = [{transform_indices = @transform_0, window_bounds = array<i64: 2, 32>}, {pipeline_mode = #tpu.pipeline_mode<synchronous>, transform_indices = @transform_1, window_bounds = array<i64: 32, 64>}, {pipeline_mode = #tpu.pipeline_mode<synchronous>, transform_indices = @transform_2, window_bounds = array<i64: 1, 64>}, {pipeline_mode = #tpu.pipeline_mode<synchronous>, transform_indices = @transform_3, window_bounds = array<i64: 64, 24>}, {pipeline_mode = #tpu.pipeline_mode<synchronous>, transform_indices = @transform_4, window_bounds = array<i64: 1, 24>}, {transform_indices = @transform_5, window_bounds = array<i64: 2, 24>}]} {
    %c0 = arith.constant 0 : index
    %c0_0 = arith.constant 0 : index
    %0 = vector.load %arg1[%c0, %c0_0] : memref<2x32xf32, #tpu.memory_space<vmem>>, vector<2x32xf32>
    %c0_1 = arith.constant 0 : index
    %c0_2 = arith.constant 0 : index
    %1 = vector.load %arg2[%c0_1, %c0_2] : memref<32x64xf32, #tpu.memory_space<vmem>>, vector<32x64xf32>
    %cst = arith.constant dense<0.000000e+00> : vector<2x64xf32>
    %2 = tpu.matmul %0, %1, %cst {dimension_numbers = #tpu.dot_dimension_numbers<[1], [0], [0], [1], [0, 0, 1, 1], [], []>} : vector<2x32xf32>, vector<32x64xf32>, vector<2x64xf32> -> vector<2x64xf32>
    %c0_3 = arith.constant 0 : index
    %c0_4 = arith.constant 0 : index
    %3 = vector.load %arg3[%c0_3, %c0_4] : memref<1x64xf32, #tpu.memory_space<vmem>>, vector<1x64xf32>
    %4 = vector.broadcast %3 : vector<1x64xf32> to vector<2x64xf32>
    %5 = arith.addf %2, %4 : vector<2x64xf32>
    %cst_5 = arith.constant 0.000000e+00 : f32
    %6 = vector.broadcast %cst_5 : f32 to vector<2x64xf32>
    %7 = arith.maximumf %5, %6 : vector<2x64xf32>
    %c0_6 = arith.constant 0 : index
    %c0_7 = arith.constant 0 : index
    %8 = vector.load %arg4[%c0_6, %c0_7] : memref<64x24xf32, #tpu.memory_space<vmem>>, vector<64x24xf32>
    %cst_8 = arith.constant dense<0.000000e+00> : vector<2x24xf32>
    %9 = tpu.matmul %7, %8, %cst_8 {dimension_numbers = #tpu.dot_dimension_numbers<[1], [0], [0], [1], [0, 0, 1, 1], [], []>} : vector<2x64xf32>, vector<64x24xf32>, vector<2x24xf32> -> vector<2x24xf32>
    %c0_9 = arith.constant 0 : index
    %c0_10 = arith.constant 0 : index
    %10 = vector.load %arg5[%c0_9, %c0_10] : memref<1x24xf32, #tpu.memory_space<vmem>>, vector<1x24xf32>
    %11 = vector.broadcast %10 : vector<1x24xf32> to vector<2x24xf32>
    %12 = arith.addf %9, %11 : vector<2x24xf32>
    %c0_11 = arith.constant 0 : index
    %c0_12 = arith.constant 0 : index
    %13 = vector.load %arg6[%c0_11, %c0_12] : memref<2x24xf32, #tpu.memory_space<vmem>>, vector<2x24xf32>
    tpu.vector_store %arg6[%c0_11, %c0_12], %12 {strides = array<i32>} : memref<2x24xf32, #tpu.memory_space<vmem>>, vector<2x24xf32>,
    return
  }
  func.func @transform_0(%arg0: i32) -> (i32, i32) {
    %c0_i32 = arith.constant 0 : i32
    %c0_i32_0 = arith.constant 0 : i32
    return %arg0, %c0_i32 : i32, i32
  }
  func.func @transform_1(%arg0: i32) -> (i32, i32) {
    %c0_i32 = arith.constant 0 : i32
    %c0_i32_0 = arith.constant 0 : i32
    %c0_i32_1 = arith.constant 0 : i32
    return %c0_i32, %c0_i32_0 : i32, i32
  }
  func.func @transform_2(%arg0: i32) -> (i32, i32) {
    %c0_i32 = arith.constant 0 : i32
    %c0_i32_0 = arith.constant 0 : i32
    %c0_i32_1 = arith.constant 0 : i32
    return %c0_i32, %c0_i32_0 : i32, i32
  }
  func.func @transform_3(%arg0: i32) -> (i32, i32) {
    %c0_i32 = arith.constant 0 : i32
    %c0_i32_0 = arith.constant 0 : i32
    %c0_i32_1 = arith.constant 0 : i32
    return %c0_i32, %c0_i32_0 : i32, i32
  }
  func.func @transform_4(%arg0: i32) -> (i32, i32) {
    %c0_i32 = arith.constant 0 : i32
    %c0_i32_0 = arith.constant 0 : i32
    %c0_i32_1 = arith.constant 0 : i32
    return %c0_i32, %c0_i32_0 : i32, i32
  }
  func.func @transform_5(%arg0: i32) -> (i32, i32) {
    %c0_i32 = arith.constant 0 : i32
    %c0_i32_0 = arith.constant 0 : i32
    return %arg0, %c0_i32 : i32, i32
  }
}

</mosaic_0001>

<bundles_post_ra>
// kernel: _refined_forward_impl.1
= control target key start
LH: loop header
LB: loop body
LE: loop exit
PB: predicated region body
PF: predicated region fallthrough
CT: control target
= control target key end

     0   :  { %v315_v0 = vmov 0.0|0.0   ;;  %vm316_vm0 = vmmov 0   ;;  %v317_v4 = vmov 0.0   ;;  %vm52_vm1 = vcmask 261120   ;;  %s396_s1 = inlined_call_operand.vmem [shape: f32[32,64], index: 1, kind: input, shape index: {}]   ;;  %s397_s3 = inlined_call_operand.vmem [shape: f32[64,24], index: 3, kind: input, shape index: {}]   ;;  %s398_s0 = inlined_call_operand.vmem [shape: f32[2,32], index: 0, kind: input, shape index: {}]   ;;  %s399_s2 = inlined_call_operand.vmem [shape: f32[1,64], index: 2, kind: input, shape index: {}]   ;;  %s400_s4 = inlined_call_operand.vmem [shape: f32[1,24], index: 4, kind: input, shape index: {}]   ;;  %s401_s5 = inlined_call_operand.vmem [shape: f32[2,24], index: 5, kind: output, shape index: {}]  }
   0x1   :  { %294 = vmatprep.subr.bf16.mxu0 %v315_v0  ;;  %v41_v1 = vld [vmem:[%s396_s1] sm:$0xff]  ;;  %v42_v2 = vld [vmem:[%s396_s1 + $0x8] sm:$0xff]  ;;  %v43_v3 = vld [vmem:[%s396_s1 + $0x10] sm:$0xff]  ;;  %272 = vmatprep.mubr.msk.f32.mxu0 %vm316_vm0, %v317_v4  ;;  %vm142_vm2 = vcmask 523264   ;;  %vm216_vm3 = vcmask 189440  }
   0x2   :  { %v295_v5 = vpack.c.bf16 %v42_v2, %v41_v1  ;;  %v44_v6 = vld [vmem:[%s396_s1 + $0x18] sm:$0xff]  ;;  %300 = vmatprep.subr.bf16.mxu1 %v315_v0  ;;  %v127_v7 = vld [vmem:[%s397_s3] sm:$0xff]  ;;  %v128_v8 = vld [vmem:[%s397_s3 + $0x8] sm:$0xff]  ;;  %291 = vmatprep.mubr.msk.f32.mxu1 %vm316_vm0, %v317_v4 }
   0x3   :  { %v301_v9 = vpack.c.bf16 %v128_v8, %v127_v7  ;;  %v129_v10 = vld [vmem:[%s397_s3 + $0x10] sm:$0xff]  ;;  %v130_v11 = vld [vmem:[%s397_s3 + $0x18] sm:$0xff]  ;;  %v298_v12 = vpack.c.bf16 %v44_v6, %v43_v3  ;;  %v131_v14 = vld [vmem:[%s397_s3 + $0x20] sm:$0xff] }
   0x4   :  { %296 = vmatpush3.bf16.msra.mxu0 %v295_v5  ;;  %v304_v13 = vpack.c.bf16 %v130_v11, %v129_v10  ;;  %v132_v15 = vld [vmem:[%s397_s3 + $0x28] sm:$0xff]  ;;  %v40_v17 = vld [vmem:[%s398_s0] sm:$0x3]  ;;  %v133_v18 = vld [vmem:[%s397_s3 + $0x30] sm:$0xff] }
   0x5   :  { %297 = vmatprep.subr.bf16.mxu0 %v315_v0  ;;  %302 = vmatpush3.bf16.msra.mxu1 %v301_v9  ;;  %v307_v16 = vpack.c.bf16 %v132_v15, %v131_v14  ;;  %v134_v19 = vld [vmem:[%s397_s3 + $0x38] sm:$0xff]  ;;  %v246_v21 = vld [vmem:[%s399_s2] ss:$0 sm:$0xff] }
   0x6   :  { %303 = vmatprep.subr.bf16.mxu1 %v315_v0  ;;  %v310_v20 = vpack.c.bf16 %v134_v19, %v133_v18  ;;  %v248_v26 = vld [vmem:[%s400_s4] ss:$0 sm:$0xff] }
   0x8   :  { %299 = vmatpush3.bf16.msra.mxu0 %v298_v12 }
   0x9   :  { %305 = vmatpush3.bf16.msra.mxu1 %v304_v13 }
   0xa   :  { %306 = vmatprep.subr.bf16.mxu1 %v315_v0 }
   0xb   :  { %273 = vmatmul.mubr.msk.f32.vlgmr.msra.gmra.mrb[0].mxu0 %vm52_vm1, %v40_v17 }
   0xd   :  { %308 = vmatpush3.bf16.msra.mxu1 %v307_v16 }
   0xe   :  { %309 = vmatprep.subr.bf16.mxu1 %v315_v0 }
  0x11   :  { %311 = vmatpush3.bf16.msra.mxu1 %v310_v20 }
  0xde   :  { %v122_v22 = vpop.f32.mrb[0].mxu0 }
  0xdf   :  { %v123_v23 = vadd.f32 %v246_v21, %v122_v22  ;;  %v274_v24 = vpop.f32.mrb[1].mxu0 }
  0xe1   :  { %v126_v25 = vmax.f32 %v123_v23, 0.0 }
  0xe3   :  { %292 = vmatmul.mubr.msk.f32.vlgmr.msra.gmra.mrb[0].mxu1 %vm142_vm2, %v126_v25 }
 0x1b6   :  { %v212_v27 = vpop.f32.mrb[0].mxu1 }
 0x1b7   :  { %v213_v28 = vadd.f32 %v248_v26, %v212_v27  ;;  %v293_v29 = vpop.f32.mrb[1].mxu1 }
 0x1b9   :  { %217 = vst.msk [vmem:[%s401_s5] sm:$0x3] %vm216_vm3, %v213_v28 }

// kernel: _refined_forward_impl.1
= control target key start
LH: loop header
LB: loop body
LE: loop exit
PB: predicated region body
PF: predicated region fallthrough
CT: control target
= control target key end

     0   :  { %v271_v0 = vmov 0.0|0.0   ;;  %vm272_vm0 = vmmov 0   ;;  %v273_v4 = vmov 0.0   ;;  %vm32_vm1 = vcmask 261120   ;;  %s352_s1 = inlined_call_operand.vmem [shape: f32[32,64], index: 1, kind: input, shape index: {}]   ;;  %s353_s3 = inlined_call_operand.vmem [shape: f32[64,24], index: 3, kind: input, shape index: {}]   ;;  %s354_s0 = inlined_call_operand.vmem [shape: f32[2,32], index: 0, kind: input, shape index: {}]   ;;  %s355_s2 = inlined_call_operand.vmem [shape: f32[1,64], index: 2, kind: input, shape index: {}]   ;;  %s356_s4 = inlined_call_operand.vmem [shape: f32[1,24], index: 4, kind: input, shape index: {}]   ;;  %s357_s5 = inlined_call_operand.vmem [shape: f32[2,24], index: 5, kind: output, shape index: {}]  }
   0x1   :  { %250 = vmatprep.subr.bf16.mxu0 %v271_v0  ;;  %v21_v1 = vld [vmem:[%s352_s1] sm:$0xff]  ;;  %v22_v2 = vld [vmem:[%s352_s1 + $0x8] sm:$0xff]  ;;  %v23_v3 = vld [vmem:[%s352_s1 + $0x10] sm:$0xff]  ;;  %228 = vmatprep.mubr.msk.f32.mxu0 %vm272_vm0, %v273_v4  ;;  %vm122_vm2 = vcmask 523264   ;;  %vm196_vm3 = vcmask 189440  }
   0x2   :  { %v251_v5 = vpack.c.bf16 %v22_v2, %v21_v1  ;;  %v24_v6 = vld [vmem:[%s352_s1 + $0x18] sm:$0xff]  ;;  %256 = vmatprep.subr.bf16.mxu1 %v271_v0  ;;  %v107_v7 = vld [vmem:[%s353_s3] sm:$0xff]  ;;  %247 = vmatprep.mubr.msk.f32.mxu1 %vm272_vm0, %v273_v4  ;;  %v108_v8 = vld [vmem:[%s353_s3 + $0x8] sm:$0xff] }
   0x3   :  { %v109_v9 = vld [vmem:[%s353_s3 + $0x10] sm:$0xff]  ;;  %v110_v10 = vld [vmem:[%s353_s3 + $0x18] sm:$0xff]  ;;  %v254_v11 = vpack.c.bf16 %v24_v6, %v23_v3  ;;  %v257_v12 = vpack.c.bf16 %v108_v8, %v107_v7  ;;  %v111_v14 = vld [vmem:[%s353_s3 + $0x20] sm:$0xff] }
   0x4   :  { %252 = vmatpush3.bf16.msra.mxu0 %v251_v5  ;;  %v260_v13 = vpack.c.bf16 %v110_v10, %v109_v9  ;;  %v112_v15 = vld [vmem:[%s353_s3 + $0x28] sm:$0xff]  ;;  %v20_v16 = vld [vmem:[%s354_s0] sm:$0x3]  ;;  %v113_v18 = vld [vmem:[%s353_s3 + $0x30] sm:$0xff] }
   0x5   :  { %253 = vmatprep.subr.bf16.mxu0 %v271_v0  ;;  %258 = vmatpush3.bf16.msra.mxu1 %v257_v12  ;;  %v263_v17 = vpack.c.bf16 %v112_v15, %v111_v14  ;;  %v114_v19 = vld [vmem:[%s353_s3 + $0x38] sm:$0xff]  ;;  %v202_v21 = vld [vmem:[%s355_s2] ss:$0 sm:$0xff] }
   0x6   :  { %259 = vmatprep.subr.bf16.mxu1 %v271_v0  ;;  %v266_v20 = vpack.c.bf16 %v114_v19, %v113_v18  ;;  %v204_v26 = vld [vmem:[%s356_s4] ss:$0 sm:$0xff] }
   0x8   :  { %255 = vmatpush3.bf16.msra.mxu0 %v254_v11 }
   0x9   :  { %261 = vmatpush3.bf16.msra.mxu1 %v260_v13 }
   0xa   :  { %262 = vmatprep.subr.bf16.mxu1 %v271_v0 }
   0xb   :  { %229 = vmatmul.mubr.msk.f32.vlgmr.msra.gmra.mrb[0].mxu0 %vm32_vm1, %v20_v16 }
   0xd   :  { %264 = vmatpush3.bf16.msra.mxu1 %v263_v17 }
   0xe   :  { %265 = vmatprep.subr.bf16.mxu1 %v271_v0 }
  0x11   :  { %267 = vmatpush3.bf16.msra.mxu1 %v266_v20 }
  0xde   :  { %v102_v22 = vpop.f32.mrb[0].mxu0 }
  0xdf   :  { %v103_v23 = vadd.f32 %v202_v21, %v102_v22  ;;  %v230_v24 = vpop.f32.mrb[1].mxu0 }
  0xe1   :  { %v106_v25 = vmax.f32 %v103_v23, 0.0 }
  0xe3   :  { %248 = vmatmul.mubr.msk.f32.vlgmr.msra.gmra.mrb[0].mxu1 %vm122_vm2, %v106_v25 }
 0x1b6   :  { %v192_v27 = vpop.f32.mrb[0].mxu1 }
 0x1b7   :  { %v193_v28 = vadd.f32 %v204_v26, %v192_v27  ;;  %v249_v29 = vpop.f32.mrb[1].mxu1 }
 0x1b9   :  { %197 = vst.msk [vmem:[%s357_s5] sm:$0x3] %vm196_vm3, %v193_v28 }

</bundles_post_ra>
